<compile_context>
chip_gen: v7x
topology: tpu7x:2x2x1
jax: 0.10.0
libtpu: 0.0.40
codegen_flags: <defaults>
</compile_context>

<pallas_src>
import functools

import jax
import jax.numpy as jnp
from jax.experimental import pallas as pl
from jax.experimental.pallas import tpu as pltpu

_MIB = 1024 * 1024


def _round_up(a: int, b: int) -> int:
    return ((a + b - 1) // b) * b


def _tpu_defaults():
    """(default tile_m, VMEM limit bytes) per TPU generation."""
    kind = ""
    try:
        kind = jax.devices()[0].device_kind.lower()
    except Exception:  # pragma: no cover - defensive
        pass
    if "v7" in kind or "tpu7" in kind:
        # v7x: 64 MiB VMEM per TC -> leave headroom for Mosaic internal scratch.
        return 512, 56 * _MIB
    if "v6" in kind or "tpu6" in kind:
        # v6e: 128 MiB VMEM, FLOP/byte breakeven tile_m ~650.
        return 1024, 100 * _MIB
    if "v5" in kind:
        # v5e: 128 MiB VMEM, breakeven tile_m ~240 (default scoped limit is
        # only 16 MiB, so the explicit override matters most here).
        return 512, 100 * _MIB
    # Unknown chip / interpret mode: conservative budget.
    return 512, 56 * _MIB


def _pick_tile_n(inter, in_size, out_size, cbytes, max_tile_n, vmem_budget):
    """Largest 128-multiple <= max_tile_n that divides the 128-aligned
    intermediate size and whose double-buffered weight chunks fit in half the
    VMEM budget (rest is reserved for x / out / f32 accumulator)."""
    inter_pad = _round_up(inter, 128)
    for cand in range(min(max_tile_n, inter_pad), 127, -128):
        if inter_pad % cand:
            continue
        w_db = 2 * (in_size * 2 * cand + cand * out_size) * cbytes
        if w_db <= vmem_budget // 2:
            return cand, inter_pad
    return 128, inter_pad


def _vmem_bytes(tile_m, tile_n, in_size, out_size, cbytes, obytes):
    """Estimated VMEM working set (double-buffered inputs/output + f32 acc)."""
    x_b = 2 * tile_m * in_size * cbytes
    wgu_b = 2 * in_size * (2 * tile_n) * cbytes
    bgu_b = 2 * (2 * tile_n) * 4
    wd_b = 2 * tile_n * out_size * cbytes
    bd_b = 2 * out_size * 4
    out_b = 2 * tile_m * out_size * obytes
    acc_b = tile_m * out_size * 4
    return x_b + wgu_b + bgu_b + wd_b + bd_b + out_b + acc_b


# ---------------------------------------------------------------------------
# Kernel
# ---------------------------------------------------------------------------
def llama_mlp_kernel(x_ref, wgu_ref, bgu_ref, wd_ref, bd_ref, o_ref, acc_ref):
    """One (M-tile, inter-chunk) step of
         out = (silu(x@Wg+bg) * (x@Wu+bu)) @ Wd + bd
    with Wg|Wu fused per chunk, accumulating the down-projection in f32."""
    n = pl.program_id(1)

    @pl.when(n == 0)
    def _():
        acc_ref[...] = jnp.zeros_like(acc_ref)

    x = x_ref[...]

    # Fused gate|up projection for this intermediate chunk (f32 acc on MXU).
    gu = jnp.dot(x, wgu_ref[...], preferred_element_type=jnp.float32) + bgu_ref[...]
    tn = gu.shape[-1] // 2          # static, multiple of 128 -> lane-aligned split
    g = gu[:, :tn]
    u = gu[:, tn:]

    # SiLU(g) * u = g * u / (1 + exp(-g)); exp + approx reciprocal use the EUP.
    h = (g * u) * pl.reciprocal(1.0 + jnp.exp(-g), approx=True)

    # Partial down-projection for this chunk; accumulate in f32 scratch.
    acc_ref[...] += jnp.dot(h.astype(wd_ref.dtype), wd_ref[...],
                            preferred_element_type=jnp.float32)

    @pl.when(n == pl.num_programs(1) - 1)
    def _():
        # bd is added exactly once, at finalize.
        o_ref[...] = (acc_ref[...] + bd_ref[...]).astype(o_ref.dtype)


# ---------------------------------------------------------------------------
# One-time weight preparation (outside the per-call hot path)
# ---------------------------------------------------------------------------
def prepare_params(wg, bg, wu, bu, wd, bd, *, max_tile_n=512,
                   compute_dtype=jnp.bfloat16):
    """Cast weights to compute_dtype, pad the intermediate dim to a 128
    multiple (zero padding contributes nothing), and fuse Wg|Wu (and bg|bu)
    chunk-wise so each grid step streams a single [in, 2*tile_n] weight block.

    Weights are expected PRE-TRANSPOSED vs PyTorch: wg/wu: [in, inter],
    wd: [inter, out].  Call this once at load time, not per forward call.
    """
    in_size, inter = wg.shape
    out_size = wd.shape[1]
    _, vmem_budget = _tpu_defaults()
    cbytes = jnp.dtype(compute_dtype).itemsize
    tile_n, inter_pad = _pick_tile_n(inter, in_size, out_size, cbytes,
                                     max_tile_n, vmem_budget)
    dn = inter_pad - inter
    grid_n = inter_pad // tile_n

    wg_p = jnp.pad(wg.astype(compute_dtype), ((0, 0), (0, dn)))
    wu_p = jnp.pad(wu.astype(compute_dtype), ((0, 0), (0, dn)))
    # Chunk-wise interleave: columns [n*2t : n*2t+t] = gate chunk n,
    #                        columns [n*2t+t : (n+1)*2t] = up chunk n.
    wgu = jnp.stack((wg_p.reshape(in_size, grid_n, tile_n),
                     wu_p.reshape(in_size, grid_n, tile_n)),
                    axis=2).reshape(in_size, 2 * inter_pad)

    bg_p = jnp.pad(bg.astype(jnp.float32), (0, dn))
    bu_p = jnp.pad(bu.astype(jnp.float32), (0, dn))
    bgu = jnp.stack((bg_p.reshape(grid_n, tile_n),
                     bu_p.reshape(grid_n, tile_n)),
                    axis=1).reshape(1, 2 * inter_pad)

    wd_p = jnp.pad(wd.astype(compute_dtype), ((0, dn), (0, 0)))
    bd_p = bd.astype(jnp.float32).reshape(1, out_size)

    return dict(wgu=wgu, bgu=bgu, wd=wd_p, bd=bd_p, tile_n=tile_n)


# ---------------------------------------------------------------------------
# Forward wrapper
# ---------------------------------------------------------------------------
@functools.partial(jax.jit, static_argnames=("tile_n", "tile_m", "compute_dtype"))
def llama_mlp(x, wgu, bgu, wd, bd, *, tile_n, tile_m=None,
              compute_dtype=jnp.bfloat16):
    """x: [..., in_size] -> [..., out_size], fused gate/up/down MLP.

    wgu/bgu/wd/bd come from prepare_params() (already cast, padded, fused)."""
    in_size = x.shape[-1]
    assert wgu.shape[0] == in_size
    inter_pad = wgu.shape[1] // 2
    assert inter_pad % tile_n == 0
    grid_n = inter_pad // tile_n
    out_size = wd.shape[1]
    out_dtype = x.dtype

    lead_shape = x.shape[:-1]
    x2d = x.reshape(-1, in_size)
    m = x2d.shape[0]

    # --- generation-aware tile_m / VMEM budget -----------------------------
    default_tile_m, vmem_budget = _tpu_defaults()
    if tile_m is None:
        tile_m = default_tile_m
    tile_m = max(16, min(tile_m, _round_up(m, 16)))      # clamp for small m

    cbytes = jnp.dtype(compute_dtype).itemsize
    obytes = jnp.dtype(out_dtype).itemsize
    usable = vmem_budget - 6 * _MIB                       # Mosaic scratch headroom
    while tile_m > 16 and _vmem_bytes(tile_m, tile_n, in_size, out_size,
                                      cbytes, obytes) > usable:
        tile_m = _round_up(tile_m // 2, 16)

    m_pad = _round_up(m, tile_m)
    grid_m = m_pad // tile_m

    # --- activation cast / pad (weights were prepared once, outside) -------
    xc = x2d.astype(compute_dtype)
    if m_pad != m:
        xc = jnp.pad(xc, ((0, m_pad - m), (0, 0)))

    # Advisory cost estimate, in sync with the actual tiling (weights are
    # re-streamed once per M tile).
    cost = pl.CostEstimate(
        flops=2 * m_pad * inter_pad * (2 * in_size + out_size),
        transcendentals=m_pad * inter_pad,
        bytes_accessed=(xc.size * cbytes
                        + grid_m * (wgu.size * wgu.dtype.itemsize
                                    + wd.size * wd.dtype.itemsize
                                    + bgu.size * bgu.dtype.itemsize
                                    + bd.size * bd.dtype.itemsize)
                        + m_pad * out_size * obytes),
    )

    out2d = pl.pallas_call(
        llama_mlp_kernel,
        out_shape=jax.ShapeDtypeStruct((m_pad, out_size), out_dtype),
        grid_spec=pltpu.PrefetchScalarGridSpec(
            num_scalar_prefetch=0,
            grid=(grid_m, grid_n),
            in_specs=[
                pl.BlockSpec((tile_m, in_size), lambda i, n: (i, 0)),      # x row-tile
                pl.BlockSpec((in_size, 2 * tile_n), lambda i, n: (0, n)),  # fused Wg|Wu
                pl.BlockSpec((1, 2 * tile_n), lambda i, n: (0, n)),        # fused bg|bu
                pl.BlockSpec((tile_n, out_size), lambda i, n: (n, 0)),     # Wd chunk
                pl.BlockSpec((1, out_size), lambda i, n: (0, 0)),          # bd
            ],
            out_specs=pl.BlockSpec((tile_m, out_size), lambda i, n: (i, 0)),
            scratch_shapes=[pltpu.VMEM((tile_m, out_size), jnp.float32)],
        ),
        compiler_params=pltpu.CompilerParams(
            dimension_semantics=("parallel", "arbitrary"),
            vmem_limit_bytes=vmem_budget,
        ),
        cost_estimate=cost,
    )(xc, wgu, bgu, wd, bd)

    if m_pad != m:
        out2d = out2d[:m]
    return out2d.reshape(*lead_shape, out_size)


# ---------------------------------------------------------------------------
# Test helpers
# ---------------------------------------------------------------------------
def init_params(key, in_size, intermediate_size, out_size, dtype=jnp.float32):
    """Deterministic init mimicking nn.Linear: U(-1/sqrt(fan_in), 1/sqrt(fan_in)).
    Weights returned already transposed to [fan_in, fan_out] for the kernel."""
    ks = jax.random.split(key, 6)

    def linear(kw, kb, fan_in, fan_out):
        bound = 1.0 / (fan_in ** 0.5)
        w = jax.random.uniform(kw, (fan_in, fan_out), dtype, -bound, bound)
        b = jax.random.uniform(kb, (fan_out,), dtype, -bound, bound)
        return w, b

    wg, bg = linear(ks[0], ks[1], in_size, intermediate_size)
    wu, bu = linear(ks[2], ks[3], in_size, intermediate_size)
    wd, bd = linear(ks[4], ks[5], intermediate_size, out_size)
    return wg, bg, wu, bu, wd, bd


def llama_mlp_ref(x, wg, bg, wu, bu, wd, bd, compute_dtype=jnp.bfloat16):
    """Pure-JAX reference mirroring the kernel's mixed-precision scheme."""
    xc = x.astype(compute_dtype)
    g = jnp.dot(xc, wg.astype(compute_dtype),
                preferred_element_type=jnp.float32) + bg.astype(jnp.float32)
    u = jnp.dot(xc, wu.astype(compute_dtype),
                preferred_element_type=jnp.float32) + bu.astype(jnp.float32)
    h = (g * jax.nn.sigmoid(g)) * u
    out = jnp.dot(h.astype(compute_dtype), wd.astype(compute_dtype),
                  preferred_element_type=jnp.float32) + bd.astype(jnp.float32)
    return out.astype(x.dtype)


if __name__ == "__main__":
    # Small shapes consistent with the module's forward: [batch, seq, in_size].
    batch, seq = 2, 8
    in_size, intermediate_size, out_size = 32, 64, 32

    key = jax.random.PRNGKey(0)
    kx, kp = jax.random.split(key)
    x = jax.random.normal(kx, (batch, seq, in_size), jnp.float32)
    wg, bg, wu, bu, wd, bd = init_params(kp, in_size, intermediate_size, out_size)

    # One-time weight preparation (cast + pad + gate/up fuse) -- not per call.
    prep = prepare_params(wg, bg, wu, bu, wd, bd)

    out = llama_mlp(x, prep["wgu"], prep["bgu"], prep["wd"], prep["bd"],
                    tile_n=prep["tile_n"])
    out = jax.block_until_ready(out)

    ref = llama_mlp_ref(x, wg, bg, wu, bu, wd, bd)
    ref_f32 = (jax.nn.silu(x @ wg + bg) * (x @ wu + bu)) @ wd + bd

    assert out.shape == (batch, seq, out_size), out.shape
    # Tight check vs the mixed-precision reference (same bf16 inputs, f32 acc).
    assert jnp.allclose(out, ref, atol=2e-2, rtol=2e-2), float(
        jnp.max(jnp.abs(out - ref)))
    # Looser sanity check vs the full-f32 math.
    assert jnp.allclose(out, ref_f32, atol=5e-2, rtol=5e-2), float(
        jnp.max(jnp.abs(out - ref_f32)))

    print("KERNEL_OK")
</pallas_src>

<mosaic_0001>
module attributes {stable_mosaic.version = 11 : i64} {
  func.func @llama_mlp_kernel(%arg0: i32, %arg1: i32, %arg2: memref<16x32xbf16, #tpu.memory_space<vmem>>, %arg3: memref<32x256xbf16, #tpu.memory_space<vmem>>, %arg4: memref<1x256xf32, #tpu.memory_space<vmem>>, %arg5: memref<128x32xbf16, #tpu.memory_space<vmem>>, %arg6: memref<1x32xf32, #tpu.memory_space<vmem>>, %arg7: memref<16x32xf32, #tpu.memory_space<vmem>>, %arg8: memref<16x32xf32, #tpu.memory_space<vmem>>) attributes {dimension_semantics = [#tpu.dimension_semantics<parallel>, #tpu.dimension_semantics<arbitrary>], iteration_bounds = array<i64: 1, 1>, scalar_prefetch = 0 : i64, scratch_operands = 1 : i64, tpu.core_type = #tpu.core_type<tc>, window_params = [{transform_indices = @transform_0, window_bounds = array<i64: 16, 32>}, {transform_indices = @transform_1, window_bounds = array<i64: 32, 256>}, {transform_indices = @transform_2, window_bounds = array<i64: 1, 256>}, {transform_indices = @transform_3, window_bounds = array<i64: 128, 32>}, {pipeline_mode = #tpu.pipeline_mode<synchronous>, transform_indices = @transform_4, window_bounds = array<i64: 1, 32>}, {transform_indices = @transform_5, window_bounds = array<i64: 16, 32>}]} {
    %c0_i32 = arith.constant 0 : i32
    %0 = arith.cmpi eq, %arg1, %c0_i32 : i32
    %1 = arith.extui %0 : i1 to i32
    %c0_i32_0 = arith.constant 0 : i32
    %2 = arith.cmpi ne, %1, %c0_i32_0 : i32
    scf.if %2 {
      %cst_17 = arith.constant 0.000000e+00 : f32
      %28 = vector.broadcast %cst_17 : f32 to vector<16x32xf32>
      %c0_18 = arith.constant 0 : index
      %c0_19 = arith.constant 0 : index
      %29 = vector.load %arg8[%c0_18, %c0_19] : memref<16x32xf32, #tpu.memory_space<vmem>>, vector<16x32xf32>
      tpu.vector_store %arg8[%c0_18, %c0_19], %28 {strides = array<i32>} : memref<16x32xf32, #tpu.memory_space<vmem>>, vector<16x32xf32>,
    } else {
    }
    %c0 = arith.constant 0 : index
    %c0_1 = arith.constant 0 : index
    %3 = vector.load %arg2[%c0, %c0_1] : memref<16x32xbf16, #tpu.memory_space<vmem>>, vector<16x32xbf16>
    %c0_2 = arith.constant 0 : index
    %c0_3 = arith.constant 0 : index
    %4 = vector.load %arg3[%c0_2, %c0_3] : memref<32x256xbf16, #tpu.memory_space<vmem>>, vector<32x256xbf16>
    %cst = arith.constant dense<0.000000e+00> : vector<16x256xf32>
    %5 = tpu.matmul %3, %4, %cst {dimension_numbers = #tpu.dot_dimension_numbers<[1], [0], [0], [1], [0, 0, 1, 1], [], []>} : vector<16x32xbf16>, vector<32x256xbf16>, vector<16x256xf32> -> vector<16x256xf32>
    %c0_4 = arith.constant 0 : index
    %c0_5 = arith.constant 0 : index
    %6 = vector.load %arg4[%c0_4, %c0_5] : memref<1x256xf32, #tpu.memory_space<vmem>>, vector<1x256xf32>
    %7 = vector.broadcast %6 : vector<1x256xf32> to vector<16x256xf32>
    %8 = arith.addf %5, %7 : vector<16x256xf32>
    %9 = vector.extract_strided_slice %8 {offsets = [0, 0], sizes = [16, 128], strides = [1, 1]} : vector<16x256xf32> to vector<16x128xf32>
    %10 = vector.extract_strided_slice %8 {offsets = [0, 128], sizes = [16, 128], strides = [1, 1]} : vector<16x256xf32> to vector<16x128xf32>
    %11 = arith.mulf %9, %10 : vector<16x128xf32>
    %cst_6 = arith.constant 0.000000e+00 : f32
    %12 = vector.broadcast %cst_6 : f32 to vector<16x128xf32>
    %13 = arith.subf %12, %9 : vector<16x128xf32>
    %14 = math.exp %13 : vector<16x128xf32>
    %cst_7 = arith.constant 1.000000e+00 : f32
    %15 = vector.broadcast %cst_7 : f32 to vector<16x128xf32>
    %16 = arith.addf %15, %14 : vector<16x128xf32>
    %17 = tpu.reciprocal %16 {approx = true} : vector<16x128xf32> -> vector<16x128xf32>
    %18 = arith.mulf %11, %17 : vector<16x128xf32>
    %c0_8 = arith.constant 0 : index
    %c0_9 = arith.constant 0 : index
    %19 = vector.load %arg8[%c0_8, %c0_9] : memref<16x32xf32, #tpu.memory_space<vmem>>, vector<16x32xf32>
    %20 = arith.truncf %18 : vector<16x128xf32> to vector<16x128xbf16>
    %c0_10 = arith.constant 0 : index
    %c0_11 = arith.constant 0 : index
    %21 = vector.load %arg5[%c0_10, %c0_11] : memref<128x32xbf16, #tpu.memory_space<vmem>>, vector<128x32xbf16>
    %cst_12 = arith.constant dense<0.000000e+00> : vector<16x32xf32>
    %22 = tpu.matmul %20, %21, %cst_12 {dimension_numbers = #tpu.dot_dimension_numbers<[1], [0], [0], [1], [0, 0, 1, 1], [], []>} : vector<16x128xbf16>, vector<128x32xbf16>, vector<16x32xf32> -> vector<16x32xf32>
    %23 = arith.addf %19, %22 : vector<16x32xf32>
    %c0_13 = arith.constant 0 : index
    %c0_14 = arith.constant 0 : index
    %24 = vector.load %arg8[%c0_13, %c0_14] : memref<16x32xf32, #tpu.memory_space<vmem>>, vector<16x32xf32>
    tpu.vector_store %arg8[%c0_13, %c0_14], %23 {strides = array<i32>} : memref<16x32xf32, #tpu.memory_space<vmem>>, vector<16x32xf32>,
    %c0_i32_15 = arith.constant 0 : i32
    %25 = arith.cmpi eq, %arg1, %c0_i32_15 : i32
    %26 = arith.extui %25 : i1 to i32
    %c0_i32_16 = arith.constant 0 : i32
    %27 = arith.cmpi ne, %26, %c0_i32_16 : i32
    scf.if %27 {
      %c0_17 = arith.constant 0 : index
      %c0_18 = arith.constant 0 : index
      %28 = vector.load %arg8[%c0_17, %c0_18] : memref<16x32xf32, #tpu.memory_space<vmem>>, vector<16x32xf32>
      %c0_19 = arith.constant 0 : index
      %c0_20 = arith.constant 0 : index
      %29 = vector.load %arg6[%c0_19, %c0_20] : memref<1x32xf32, #tpu.memory_space<vmem>>, vector<1x32xf32>
      %30 = vector.broadcast %29 : vector<1x32xf32> to vector<16x32xf32>
      %31 = arith.addf %28, %30 : vector<16x32xf32>
      %c0_21 = arith.constant 0 : index
      %c0_22 = arith.constant 0 : index
      %32 = vector.load %arg7[%c0_21, %c0_22] : memref<16x32xf32, #tpu.memory_space<vmem>>, vector<16x32xf32>
      tpu.vector_store %arg7[%c0_21, %c0_22], %31 {strides = array<i32>} : memref<16x32xf32, #tpu.memory_space<vmem>>, vector<16x32xf32>,
    } else {
    }
    return
  }
  func.func @transform_0(%arg0: i32, %arg1: i32) -> (i32, i32) {
    %c0_i32 = arith.constant 0 : i32
    %c0_i32_0 = arith.constant 0 : i32
    return %arg0, %c0_i32 : i32, i32
  }
  func.func @transform_1(%arg0: i32, %arg1: i32) -> (i32, i32) {
    %c0_i32 = arith.constant 0 : i32
    %c0_i32_0 = arith.constant 0 : i32
    return %c0_i32, %arg1 : i32, i32
  }
  func.func @transform_2(%arg0: i32, %arg1: i32) -> (i32, i32) {
    %c0_i32 = arith.constant 0 : i32
    %c0_i32_0 = arith.constant 0 : i32
    return %c0_i32, %arg1 : i32, i32
  }
  func.func @transform_3(%arg0: i32, %arg1: i32) -> (i32, i32) {
    %c0_i32 = arith.constant 0 : i32
    %c0_i32_0 = arith.constant 0 : i32
    return %arg1, %c0_i32 : i32, i32
  }
  func.func @transform_4(%arg0: i32, %arg1: i32) -> (i32, i32) {
    %c0_i32 = arith.constant 0 : i32
    %c0_i32_0 = arith.constant 0 : i32
    %c0_i32_1 = arith.constant 0 : i32
    return %c0_i32, %c0_i32_0 : i32, i32
  }
  func.func @transform_5(%arg0: i32, %arg1: i32) -> (i32, i32) {
    %c0_i32 = arith.constant 0 : i32
    %c0_i32_0 = arith.constant 0 : i32
    return %arg0, %c0_i32 : i32, i32
  }
}

</mosaic_0001>

<bundles_post_ra>
// kernel: llama_mlp.1
= control target key start
LH: loop header
LB: loop body
LE: loop exit
PB: predicated region body
PF: predicated region fallthrough
CT: control target
= control target key end

     0   :  { %v374_v2 = vmov 0   ;;  %vm26_vm0 = vcmask 261120   ;;  %s474_s0 = inlined_call_operand.vmem [shape: bf16[16,32], index: 0, kind: input, shape index: {}]   ;;  %s475_s1 = inlined_call_operand.vmem [shape: bf16[32,256], index: 1, kind: input, shape index: {}]   ;;  %s476_s2 = inlined_call_operand.vmem [shape: f32[1,256], index: 2, kind: input, shape index: {}]   ;;  %s477_s3 = inlined_call_operand.vmem [shape: bf16[128,32], index: 3, kind: input, shape index: {}]   ;;  %s478_s4 = inlined_call_operand.vmem [shape: f32[1,32], index: 4, kind: input, shape index: {}]   ;;  %s479_s5 = inlined_call_operand.hbm [shape: f32[16,32], index: 5, kind: output, shape index: {}]  }
   0x1   :  { %v327_v0 = vld [vmem:[%s475_s1 + $0x4] ss:$8 sps:$4 sm:$0xff]   ;;  %v329_v1 = vld [vmem:[%s475_s1] ss:$8 sps:$4 sm:$0xff]   ;;  %108 = vmatprep.mubr.bf16.mxu0 %v374_v2  ;;  %v330_v3 = vld [vmem:[%s475_s1 + $0x14] ss:$8 sps:$4 sm:$0xff]  }
   0x2   :  { %76 = vmatprep.subr.bf16.mxu0 %v327_v0  ;;  %v332_v4 = vld [vmem:[%s475_s1 + $0x10] ss:$8 sps:$4 sm:$0xff]   ;;  %v333_v5 = vld [vmem:[%s474_s0] sm:$0xff]  }
   0x3   :  { %77 = vmatpush1.bf16.msra.mxu0 %v329_v1 }
   0x4   :  { %78 = vmatprep.subr.bf16.mxu0 %v330_v3 }
   0x7   :  { %79 = vmatpush1.bf16.msra.mxu0 %v332_v4 }
   0x8   :  { %10 = vsyncpa [#allocation4], 0  ;;  %v334_v6 = vld [vmem:[%s477_s3] sm:$0xff]   ;;  %v375_v7 = vmov 0.0   ;;  %v335_v8 = vld [vmem:[%s477_s3 + $0x8] sm:$0xff]   ;;  %vm376_vm1 = vmmov 0   ;;  %v37_v15 = vlaneseq }
   0x9   :  { %301 = vmatprep.subr.bf16.mxu1 %v375_v7  ;;  %27 = vst.msk [vmem:[#allocation2] sm:$0xff] %vm26_vm0, %v375_v7  ;;  %28 = vst.msk [vmem:[#allocation2 + $0x8] sm:$0xff] %vm26_vm0, %v375_v7  ;;  %v336_v9 = vld [vmem:[%s477_s3 + $0x10] sm:$0xff]   ;;  %v337_v10 = vld [vmem:[%s477_s3 + $0x18] sm:$0xff]   ;;  %317 = vmatprep.mubr.msk.bf16.mxu1 %vm376_vm1, %v375_v7  ;;  %s377_s19 = smov [#allocation3]  }
   0xa   :  { %282 = vmatmul.mubr.msk.bf16.vlgmr.msra.gmra.mrb[0].mxu0 %vm26_vm0, %v333_v5  ;;  %302 = vmatpush3.bf16.msra.mxu1 %v334_v6  ;;  %v338_v11 = vld [vmem:[%s477_s3 + $0x20] sm:$0xff]   ;;  %v339_v12 = vld [vmem:[%s477_s3 + $0x28] sm:$0xff]   ;;  %v340_v13 = vld [vmem:[%s477_s3 + $0x30] sm:$0xff]   ;;  %v38_v16 = vshrl.u32 %v37_v15, 7  ;;  %s266_s20 = sshll.u32 %s377_s19, 4  ;;  %s267_s20 = int_to_ptr.vmem [resolvable:$true] %s266_s20 }
   0xb   :  { %303 = vmatprep.subr.bf16.mxu1 %v375_v7  ;;  %v341_v14 = vld [vmem:[%s477_s3 + $0x38] sm:$0xff]   ;;  %v35_v18 = vld [vmem:[%s476_s2] sm:$0x3]  ;;  %s350_s21 = scalar_lea.vmem %s267_s20, 256  ;;  %p355_p1 = scmp.lt.s32.totalorder %s267_s20, %s267_s20 }
   0xc   :  { %v39_v17 = vsub.s32 0, %v38_v16  ;;  %v43_v19 = vsub.s32 1, %v38_v16  ;;  %v291_v53 = vld [vmem:[%s478_s4] ss:$0 sm:$0xff]  ;;  %p351_p0 = scmp.ne.s32.totalorder %s267_s20, %s350_s21  ;;  %p356_p2 = scmp.lt.s32.totalorder %s350_s21, %s350_s21 }
   0xe   :  { %304 = vmatpush3.bf16.msra.mxu1 %v335_v8  ;;  %v40_v20 = vrot.slane %v35_v18, %v39_v17  ;;  %v44_v21 = vrot.slane %v35_v18, %v43_v19  ;;  %p357_p3 = por %p356_p2, %p355_p1 }
   0xf   :  { %305 = vmatprep.subr.bf16.mxu1 %v375_v7 }
  0x10   :  { %v133_v45 = vld [vmem:[#allocation2] sm:$0xff]  ;;  %v134_v47 = vld [vmem:[#allocation2 + $0x8] sm:$0xff]  ;;  %p358_p4 = pnand %p357_p3, %p351_p0 }
  0x12   :  { %306 = vmatpush3.bf16.msra.mxu1 %v336_v9 }
  0x13   :  { %307 = vmatprep.subr.bf16.mxu1 %v375_v7 }
  0x16   :  { %308 = vmatpush3.bf16.msra.mxu1 %v337_v10 }
  0x17   :  { %309 = vmatprep.subr.bf16.mxu1 %v375_v7 }
  0x1a   :  { %310 = vmatpush3.bf16.msra.mxu1 %v338_v11 }
  0x1b   :  { %311 = vmatprep.subr.bf16.mxu1 %v375_v7 }
  0x1e   :  { %312 = vmatpush3.bf16.msra.mxu1 %v339_v12 }
  0x1f   :  { %313 = vmatprep.subr.bf16.mxu1 %v375_v7 }
  0x22   :  { %314 = vmatpush3.bf16.msra.mxu1 %v340_v13 }
  0x23   :  { %315 = vmatprep.subr.bf16.mxu1 %v375_v7 }
  0x26   :  { %316 = vmatpush3.bf16.msra.mxu1 %v341_v14 }
  0xdd   :  { %v110_v22 = vpop.f32.mrb[0].mxu0 }
  0xde   :  { %v111_v23 = vadd.f32 %v110_v22, %v40_v20  ;;  %v112_v24 = vpop.f32.mrb[1].mxu0 }
  0xdf   :  { %v113_v25 = vadd.f32 %v112_v24, %v44_v21  ;;  %v114_v26 = vpop.f32.mrb[2].mxu0 }
  0xe0   :  { %v121_v27 = vsub.f32 0.0, %v111_v23  ;;  %v115_v28 = vadd.f32 %v114_v26, %v40_v20  ;;  %v116_v29 = vpop.f32.mrb[3].mxu0 }
  0xe1   :  { %v119_v30 = vmul.f32 %v113_v25, %v111_v23  ;;  %v117_v31 = vadd.f32 %v116_v29, %v44_v21 }
  0xe2   :  { %v123_v32 = vmul.f32 1.442695, %v121_v27  ;;  %v122_v33 = vsub.f32 0.0, %v115_v28 }
  0xe3   :  { %v120_v34 = vmul.f32 %v117_v31, %v115_v28 }
  0xe4   :  { %342 = vpow2.f32 %v123_v32  ;;  %v125_v35 = vmul.f32 1.442695, %v122_v33 }
  0xe6   :  { %344 = vpow2.f32 %v125_v35 }
  0xee   :  { %v343_v36 = vpop.eup %342 }
  0xef   :  { %v127_v37 = vadd.f32 1.0, %v343_v36 }
  0xf0   :  { %v345_v38 = vpop.eup %344 }
  0xf1   :  { %346 = vrcp.f32 %v127_v37  ;;  %v128_v39 = vadd.f32 1.0, %v345_v38 }
  0xf3   :  { %348 = vrcp.f32 %v128_v39 }
  0xfb   :  { %v347_v40 = vpop.eup %346 }
  0xfc   :  { %v131_v41 = vmul.f32 %v347_v40, %v119_v30 }
  0xfd   :  { %v349_v42 = vpop.eup %348 }
  0xfe   :  { %v132_v43 = vmul.f32 %v349_v42, %v120_v34 }
 0x100   :  { %v135_v44 = vpack.c.bf16 %v132_v43, %v131_v41 }
 0x102   :  { %318 = vmatmul.mubr.bf16.vlgmr.msra.gmra.mrb[0].mxu1 %v135_v44 }
 0x1d5   :  { %v234_v46 = vpop.f32.mrb[0].mxu1 }
 0x1d6   :  { %v241_v48 = vadd.f32 %v234_v46, %v133_v45  ;;  %v319_v49 = vpop.f32.mrb[1].mxu1 }
 0x1d7   :  { %v237_v50 = vpop.f32.mrb[2].mxu1 }
 0x1d8   :  { %243 = vst.msk [vmem:[#allocation2] sm:$0xff] %vm26_vm0, %v241_v48  ;;  %v242_v51 = vadd.f32 %v237_v50, %v134_v47  ;;  %v320_v52 = vpop.f32.mrb[3].mxu1 }
 0x1da   :  { %244 = vst.msk [vmem:[#allocation2 + $0x8] sm:$0xff] %vm26_vm0, %v242_v51 }
 0x1df   :  { %v248_v54 = vld [vmem:[#allocation2] sm:$0xff] }
 0x1e0   :  { %v257_v55 = vadd.f32 %v291_v53, %v248_v54 }
 0x1e1   :  { %v249_v56 = vld [vmem:[#allocation2 + $0x8] sm:$0xff] }
 0x1e2   :  { %v258_v57 = vadd.f32 %v291_v53, %v249_v56  ;;  %259 = vst.msk [vmem:[#allocation3] sm:$0xff] %vm26_vm0, %v257_v55 }
 0x1e4   :  { %260 = vst.msk [vmem:[#allocation3 + $0x8] sm:$0xff] %vm26_vm0, %v258_v57 }
 0x1e5   :  { %361 = shalt.err (!%p358_p4)
}
 0x1e6   :  { %s362_s23 = scalar_lea.hbm %s479_s5, 256 }
 0x1e7   :  { %p363_p5 = scmp.ne.s32.totalorder %s479_s5, %s362_s23  ;;  %p366_p6 = scmp.lt.u32.totalorder %s362_s23, %s479_s5 }
 0x1e9   :  { %p368_p7 = pnand %p366_p6, %p363_p5 }
 0x1eb   :  { %371 = shalt.err (!%p368_p7)
}
 0x1ec   :  { %s378_s28 = smov 128   ;;  %s379_s29 = smov 8  }
 0x1ed   :  { %272 = dma.vmem_to_hbm [thread:$0]  %s267_s20, 256, %s479_s5, [#allocation4], %s378_s28, %s378_s28, %s379_s29  }
 0x1ee   :  { %372 = dma.done.wait [#allocation4], 256  }
 0x1ef   :  { %373 = vsyncadd [#allocation4], 4294967040 }
 0x1f0   :  { %276 = vsyncpa [#allocation4], 1 }

</bundles_post_ra>
